<compile_context>
chip_gen: v5e
topology: v5e:2x2
jax: 0.10.0
libtpu: 0.0.40
codegen_flags: <defaults>
</compile_context>

<pallas_src>
import functools
import math

import jax
import jax.numpy as jnp
from jax import lax
from jax.experimental import pallas as pl
from jax.experimental.pallas import tpu as pltpu

# Sum of all streamed data blocks per grid step, in *padded* VMEM bytes.
# ~12 MiB -> ~24 MiB double-buffered: fits v7x's 64 MiB physical VMEM with
# headroom and keeps per-step overhead (~0.35us) <10% of DMA time at 3.2 TB/s.
_TOTAL_BLOCK_TARGET_BYTES = 12 * 1024 * 1024
_VMEM_LIMIT_BYTES = 48 * 1024 * 1024


def _round_up(x, m):
    return (x + m - 1) // m * m


def _sublanes(dtype):
    # VMEM sublane granularity: 8 for 32-bit, 16 for 16-bit, 32 for 8-bit.
    return max(8, 32 // jnp.dtype(dtype).itemsize)


def _fastspeech_mse_kernel(
    *refs,
    mode,               # "mask_bf" | "mask_tf" | "plain"
    feat: int,          # flattened feature size (mask_bf only)
    block_span: int,    # columns per block (mask_bf) / rows per block (others)
    rows_total: int,    # total rows (plain sum path edge masking)
    emit_sum: bool,     # True -> per-tile partial sums, False -> elementwise loss
    take_log_input: bool,
    take_log_target: bool,
    cmin: float,
    cmax,
):
    if mode == "plain":
        x_ref, y_ref, out_ref = refs
        lens_ref = None
    else:
        lens_ref, x_ref, y_ref, out_ref = refs

    # Elementwise loss in f32 (PyTorch calls .float() before clamp/log).
    x = x_ref[...].astype(jnp.float32)
    y = y_ref[...].astype(jnp.float32)
    # TODO(synk): on v7x, if the EUP slot (two f32 log tiles/step) ever binds
    # instead of DMA, compute the logs in bf16 for bf16 inputs.
    if take_log_input:
        x = jnp.log(jnp.clip(x, cmin, cmax))
    if take_log_target:
        y = jnp.log(jnp.clip(y, cmin, cmax))
    d = x - y
    loss = d * d        # plain VPU multiply; filler under the DMA

    pid = pl.program_id(0)
    if mode == "mask_bf":
        # (B, T*feat) layout: lane column c maps to time t = c // feat, and
        # t < len  <=>  c < len * feat  (no integer division needed).
        col = pid * block_span + lax.broadcasted_iota(jnp.int32, loss.shape, 1)
        valid = col < lens_ref[...] * feat              # lens_ref: (B, 1)
        loss = jnp.where(valid, loss, 0.0)              # select: kills NaN/inf
    elif mode == "mask_tf":
        # (T, B*feat) layout: sublane row index is time; lens_ref is the
        # per-column length row (length repeated feat times), shape (1, B*feat).
        row = pid * block_span + lax.broadcasted_iota(jnp.int32, loss.shape, 0)
        valid = row < lens_ref[...]
        loss = jnp.where(valid, loss, 0.0)
    elif emit_sum:
        # Unmasked sum/mean: zero out-of-range rows of a partial edge block.
        row = pid * block_span + lax.broadcasted_iota(
            jnp.int32, (loss.shape[0], 1), 0)
        loss = jnp.where(row < rows_total, loss, 0.0)

    if emit_sum:
        # One tiny lane-dense partial-sum block per step; final add in the
        # wrapper keeps the grid axis "parallel" (v7x megacore friendly).
        out_ref[...] = jnp.broadcast_to(jnp.sum(loss), out_ref.shape)
    else:
        out_ref[...] = loss.astype(out_ref.dtype)


def fastspeech_mse_loss(
    input_,
    target,
    length=None,
    *,
    take_log=False,
    reduction=None,
    batch_first=False,
    clamp_min=None,
    clamp_max=None,
):
    """JAX/Pallas port of FastSpeechMSELoss.forward."""
    if isinstance(take_log, bool):
        take_log_input = take_log_target = take_log
    else:
        take_log_input = take_log["input"]
        take_log_target = take_log["target"]

    if reduction is None:
        reduction = "none"
    if reduction not in ("none", "sum", "mean"):
        raise ValueError(f"reduction={reduction} is not supported.")
    cmin = 0.0 if clamp_min is None else float(clamp_min)

    orig_shape = input_.shape
    if target.shape != orig_shape:
        raise ValueError("input and target must have the same shape.")
    d0, d1 = int(orig_shape[0]), int(orig_shape[1])
    feat = 1
    for s in orig_shape[2:]:
        feat *= int(s)

    any_log = take_log_input or take_log_target
    loss_dtype = (jnp.float32 if any_log
                  else jnp.result_type(input_.dtype, target.dtype))

    use_mask = length is not None
    emit_sum = reduction in ("sum", "mean")

    # Tensors that stream HBM<->VMEM every grid step (for padded-size sizing).
    streamed_dtypes = [input_.dtype, target.dtype]
    if not emit_sum:
        streamed_dtypes.append(loss_dtype)

    inputs, in_specs = [], []
    T = None

    if use_mask:
        T = d1 if batch_first else d0
        B = d0 if batch_first else d1
        lens = jnp.clip(length.astype(jnp.int32).reshape(B), 0, T)

        if batch_first:
            mode = "mask_bf"
            cols_total = T * feat
            x_v = input_.reshape(B, cols_total)
            y_v = target.reshape(B, cols_total)
            # bt time steps per block; bt*feat must be a multiple of 128.
            g = 128 // math.gcd(feat, 128)
            per_unit = sum(                       # padded bytes per time step
                _round_up(B, _sublanes(dt)) * feat * jnp.dtype(dt).itemsize
                for dt in streamed_dtypes)
            bt = max(g, _TOTAL_BLOCK_TARGET_BYTES // max(per_unit, 1) // g * g)
            if T > g:
                # keep >= 2 blocks so v7x's two TensorCores both get work
                bt = min(bt, _round_up(pl.cdiv(T, 2), g))
            if bt >= T:
                bt = T
            grid_n = pl.cdiv(T, bt)
            block_span = bt * feat                # columns per block
            data_spec = pl.BlockSpec((B, block_span), lambda i: (0, i))
            lens_arr = lens.reshape(B, 1)
            lens_spec = pl.BlockSpec((B, 1), lambda i: (0, 0))
            elem_shape = (B, cols_total)
        else:
            mode = "mask_tf"
            ncols = B * feat
            x_v = input_.reshape(T, ncols)
            y_v = target.reshape(T, ncols)
            g = max(_sublanes(dt) for dt in streamed_dtypes)
            per_row = sum(                        # padded bytes per time row
                _round_up(ncols, 128) * jnp.dtype(dt).itemsize
                for dt in streamed_dtypes)
            bt = max(g, _TOTAL_BLOCK_TARGET_BYTES // max(per_row, 1) // g * g)
            if T > g:
                bt = min(bt, _round_up(pl.cdiv(T, 2), g))
            if bt >= T:
                bt = T
            grid_n = pl.cdiv(T, bt)
            block_span = bt                       # rows per block
            data_spec = pl.BlockSpec((bt, ncols), lambda i: (i, 0))
            lens_arr = jnp.repeat(lens, feat).reshape(1, ncols)
            lens_spec = pl.BlockSpec((1, ncols), lambda i: (0, 0))
            elem_shape = (T, ncols)

        inputs += [lens_arr, x_v, y_v]
        in_specs += [lens_spec, data_spec, data_spec]
        rows_total = 0
    else:
        mode = "plain"
        total = d0 * d1 * feat
        if total % 128 == 0:
            # Largest multiple of 128 (<= 8192) dividing total -> lane-dense slab.
            C = 128
            for c in range(min(total, 8192), 127, -128):
                if total % c == 0:
                    C = c
                    break
        else:
            # Fall back to the natural (d0, d1*feat) view (trailing dim == full).
            C = d1 * feat
        R = total // C
        x_v = input_.reshape(R, C)
        y_v = target.reshape(R, C)
        g = max(_sublanes(dt) for dt in streamed_dtypes)
        per_row = sum(_round_up(C, 128) * jnp.dtype(dt).itemsize
                      for dt in streamed_dtypes)
        br = max(g, _TOTAL_BLOCK_TARGET_BYTES // max(per_row, 1) // g * g)
        if R > g:
            br = min(br, _round_up(pl.cdiv(R, 2), g))
        if br >= R:
            br = R
        grid_n = pl.cdiv(R, br)
        block_span = br                           # rows per block
        data_spec = pl.BlockSpec((br, C), lambda i: (i, 0))
        inputs += [x_v, y_v]
        in_specs += [data_spec, data_spec]
        elem_shape = (R, C)
        rows_total = R

    if emit_sum:
        # Tiny lane-dense partial-sum block per grid step; final add in wrapper.
        out_shape = jax.ShapeDtypeStruct((grid_n, 1, 128), jnp.float32)
        out_spec = pl.BlockSpec((1, 1, 128), lambda i: (i, 0, 0))
    else:
        out_shape = jax.ShapeDtypeStruct(elem_shape, loss_dtype)
        out_spec = data_spec

    kernel = functools.partial(
        _fastspeech_mse_kernel,
        mode=mode,
        feat=feat,
        block_span=block_span,
        rows_total=rows_total,
        emit_sum=emit_sum,
        take_log_input=take_log_input,
        take_log_target=take_log_target,
        cmin=cmin,
        cmax=clamp_max,
    )

    out = pl.pallas_call(
        kernel,
        out_shape=out_shape,
        grid=(grid_n,),
        in_specs=in_specs,
        out_specs=out_spec,
        compiler_params=pltpu.CompilerParams(
            dimension_semantics=("parallel",),
            vmem_limit_bytes=_VMEM_LIMIT_BYTES,
        ),
    )(*inputs)

    if reduction == "none":
        return out.reshape(orig_shape)

    loss_sum = out[:, 0, 0].sum()
    if reduction == "sum":
        return loss_sum.astype(loss_dtype)

    # reduction == "mean": valid-element count from lengths only (wrapper-side).
    if use_mask:
        count = jnp.sum(
            jnp.clip(length.astype(jnp.int32), 0, T)
        ).astype(jnp.float32) * float(feat)
    else:
        count = jnp.float32(d0 * d1 * feat)
    # NOTE: like the PyTorch reference, an all-zero `length` yields 0/0 = NaN.
    return (loss_sum / count).astype(loss_dtype)


def _reference(input_, target, length, *, take_log, reduction, batch_first,
               clamp_min, clamp_max):
    """Pure-JAX reference mirroring the PyTorch forward."""
    x = input_.astype(jnp.float32)
    y = target.astype(jnp.float32)
    cmin = 0.0 if clamp_min is None else clamp_min
    if take_log:
        x = jnp.log(jnp.clip(x, cmin, clamp_max))
        y = jnp.log(jnp.clip(y, cmin, clamp_max))
    loss = (x - y) ** 2
    if length is None:
        if reduction == "mean":
            return loss.mean()
        if reduction == "sum":
            return loss.sum()
        return loss
    if batch_first:
        batch_size, max_length = loss.shape[:2]
        pad = jnp.arange(max_length)[None, :] >= length[:, None]
        pad = pad.reshape(batch_size, max_length, *((1,) * (loss.ndim - 2)))
    else:
        max_length, batch_size = loss.shape[:2]
        pad = jnp.arange(max_length)[:, None] >= length[None, :]
        pad = pad.reshape(max_length, batch_size, *((1,) * (loss.ndim - 2)))
    loss = jnp.where(pad, 0.0, loss)
    if reduction == "mean":
        non_pad = jnp.broadcast_to(~pad, loss.shape)
        return loss.sum() / non_pad.sum()
    if reduction == "sum":
        return loss.sum()
    return loss


if __name__ == "__main__":
    key = jax.random.PRNGKey(0)
    k1, k2, k3, k4, k5, k6 = jax.random.split(key, 6)

    B, L, F0, F1 = 2, 8, 4, 8
    length = jnp.array([8, 5], dtype=jnp.int32)

    def check(out, ref, name, rtol=1e-5, atol=1e-5):
        out = jax.block_until_ready(out)
        assert out.shape == ref.shape, (name, out.shape, ref.shape)
        ok = jnp.allclose(out.astype(jnp.float32), ref.astype(jnp.float32),
                          rtol=rtol, atol=atol)
        assert bool(ok), (name, out, ref)

    # --- batch_first=True, masked, take_log: mean / none --------------------
    x_bf = jax.random.uniform(k1, (B, L, F0, F1), jnp.float32, 0.1, 2.0)
    y_bf = jax.random.uniform(k2, (B, L, F0, F1), jnp.float32, 0.1, 2.0)
    kw = dict(take_log=True, batch_first=True, clamp_min=1e-3)
    check(fastspeech_mse_loss(x_bf, y_bf, length, reduction="mean", **kw),
          _reference(x_bf, y_bf, length, reduction="mean", clamp_max=None, **kw),
          "bf_mask_mean")
    check(fastspeech_mse_loss(x_bf, y_bf, length, reduction="none", **kw),
          _reference(x_bf, y_bf, length, reduction="none", clamp_max=None, **kw),
          "bf_mask_none")

    # --- batch_first=False (time-major), masked, sum --------------------------
    x_tf = jax.random.uniform(k3, (L, B, F0, F1), jnp.float32, 0.1, 2.0)
    y_tf = jax.random.uniform(k4, (L, B, F0, F1), jnp.float32, 0.1, 2.0)
    kw = dict(take_log=False, batch_first=False, clamp_min=None)
    check(fastspeech_mse_loss(x_tf, y_tf, length, reduction="sum", **kw),
          _reference(x_tf, y_tf, length, reduction="sum", clamp_max=None, **kw),
          "tf_mask_sum")

    # --- no mask (lane-dense 2-D slab): mean / none ----------------------------
    kw = dict(take_log=False, batch_first=True, clamp_min=None)
    check(fastspeech_mse_loss(x_bf, y_bf, None, reduction="mean", **kw),
          _reference(x_bf, y_bf, None, reduction="mean", clamp_max=None, **kw),
          "nomask_mean")
    check(fastspeech_mse_loss(x_bf, y_bf, None, reduction="none", **kw),
          _reference(x_bf, y_bf, None, reduction="none", clamp_max=None, **kw),
          "nomask_none")

    # --- bf16 inputs, masked batch_first, sum ---------------------------------
    x_b16 = x_bf.astype(jnp.bfloat16)
    y_b16 = y_bf.astype(jnp.bfloat16)
    kw = dict(take_log=False, batch_first=True, clamp_min=None)
    check(fastspeech_mse_loss(x_b16, y_b16, length, reduction="sum", **kw),
          _reference(x_b16, y_b16, length, reduction="sum", clamp_max=None, **kw),
          "bf16_mask_sum", rtol=1e-2, atol=1e-2)

    # --- odd feature size (feat=20, trailing dim not 128-aligned) -------------
    x_odd = jax.random.uniform(k5, (B, L, 4, 5), jnp.float32, 0.1, 2.0)
    y_odd = jax.random.uniform(k6, (B, L, 4, 5), jnp.float32, 0.1, 2.0)
    kw = dict(take_log=False, batch_first=True, clamp_min=None)
    check(fastspeech_mse_loss(x_odd, y_odd, length, reduction="none", **kw),
          _reference(x_odd, y_odd, length, reduction="none", clamp_max=None, **kw),
          "odd_mask_none")
    check(fastspeech_mse_loss(x_odd, y_odd, None, reduction="sum", **kw),
          _reference(x_odd, y_odd, None, reduction="sum", clamp_max=None, **kw),
          "odd_nomask_sum")

    print("KERNEL_OK")
</pallas_src>

<mosaic_0001>
module attributes {stable_mosaic.version = 11 : i64} {
  func.func @_fastspeech_mse_kernel(%arg0: i32, %arg1: memref<2x1xi32, #tpu.memory_space<vmem>>, %arg2: memref<2x128xf32, #tpu.memory_space<vmem>>, %arg3: memref<2x128xf32, #tpu.memory_space<vmem>>, %arg4: memref<1x1x128xf32, #tpu.memory_space<vmem>>) attributes {dimension_semantics = [#tpu.dimension_semantics<parallel>], iteration_bounds = array<i64: 2>, scalar_prefetch = 0 : i64, scratch_operands = 0 : i64, tpu.core_type = #tpu.core_type<tc>, window_params = [{pipeline_mode = #tpu.pipeline_mode<synchronous>, transform_indices = @transform_0, window_bounds = array<i64: 2, 1>}, {transform_indices = @transform_1, window_bounds = array<i64: 2, 128>}, {transform_indices = @transform_2, window_bounds = array<i64: 2, 128>}, {transform_indices = @transform_3, window_bounds = array<i64: 1, 1, 128>}]} {
    %c0 = arith.constant 0 : index
    %c0_0 = arith.constant 0 : index
    %0 = vector.load %arg2[%c0, %c0_0] : memref<2x128xf32, #tpu.memory_space<vmem>>, vector<2x128xf32>
    %c0_1 = arith.constant 0 : index
    %c0_2 = arith.constant 0 : index
    %1 = vector.load %arg3[%c0_1, %c0_2] : memref<2x128xf32, #tpu.memory_space<vmem>>, vector<2x128xf32>
    %cst = arith.constant 1.000000e-03 : f32
    %2 = vector.broadcast %cst : f32 to vector<2x128xf32>
    %3 = arith.maximumf %2, %0 : vector<2x128xf32>
    %4 = math.log %3 : vector<2x128xf32>
    %cst_3 = arith.constant 1.000000e-03 : f32
    %5 = vector.broadcast %cst_3 : f32 to vector<2x128xf32>
    %6 = arith.maximumf %5, %1 : vector<2x128xf32>
    %7 = math.log %6 : vector<2x128xf32>
    %8 = arith.subf %4, %7 : vector<2x128xf32>
    %9 = arith.mulf %8, %8 : vector<2x128xf32>
    %c128_i32 = arith.constant 128 : i32
    %10 = arith.muli %arg0, %c128_i32 : i32
    %11 = tpu.iota {dimensions = array<i32: 1>} : vector<2x128xi32>
    %12 = vector.broadcast %10 : i32 to vector<2x128xi32>
    %13 = arith.addi %12, %11 : vector<2x128xi32>
    %c0_4 = arith.constant 0 : index
    %c0_5 = arith.constant 0 : index
    %14 = vector.load %arg1[%c0_4, %c0_5] : memref<2x1xi32, #tpu.memory_space<vmem>>, vector<2x1xi32>
    %c32_i32 = arith.constant 32 : i32
    %15 = vector.broadcast %c32_i32 : i32 to vector<2x1xi32>
    %16 = arith.muli %14, %15 : vector<2x1xi32>
    %17 = vector.broadcast %16 : vector<2x1xi32> to vector<2x128xi32>
    %18 = arith.cmpi slt, %13, %17 : vector<2x128xi32>
    %cst_6 = arith.constant 0.000000e+00 : f32
    %19 = vector.broadcast %cst_6 : f32 to vector<2x128xf32>
    %20 = arith.select %18, %9, %19 : vector<2x128xi1>, vector<2x128xf32>
    %21 = vector.shape_cast %20 : vector<2x128xf32> to vector<1x2x128xf32>
    %cst_7 = arith.constant dense<0.000000e+00> : vector<1xf32>
    %22 = vector.multi_reduction <add>, %21, %cst_7 [1, 2] : vector<1x2x128xf32> to vector<1xf32>
    %23 = vector.shape_cast %22 : vector<1xf32> to vector<1x1x1xf32>
    %24 = vector.extract %23[0, 0, 0] : f32 from vector<1x1x1xf32>
    %25 = vector.broadcast %24 : f32 to vector<1x1x128xf32>
    %c0_8 = arith.constant 0 : index
    %c0_9 = arith.constant 0 : index
    %c0_10 = arith.constant 0 : index
    %26 = vector.load %arg4[%c0_8, %c0_9, %c0_10] : memref<1x1x128xf32, #tpu.memory_space<vmem>>, vector<1x1x128xf32>
    tpu.vector_store %arg4[%c0_8, %c0_9, %c0_10], %25 {strides = array<i32>} : memref<1x1x128xf32, #tpu.memory_space<vmem>>, vector<1x1x128xf32>,
    return
  }
  func.func @transform_0(%arg0: i32) -> (i32, i32) {
    %c0_i32 = arith.constant 0 : i32
    %c0_i32_0 = arith.constant 0 : i32
    %c0_i32_1 = arith.constant 0 : i32
    return %c0_i32, %c0_i32_0 : i32, i32
  }
  func.func @transform_1(%arg0: i32) -> (i32, i32) {
    %c0_i32 = arith.constant 0 : i32
    %c0_i32_0 = arith.constant 0 : i32
    return %c0_i32, %arg0 : i32, i32
  }
  func.func @transform_2(%arg0: i32) -> (i32, i32) {
    %c0_i32 = arith.constant 0 : i32
    %c0_i32_0 = arith.constant 0 : i32
    return %c0_i32, %arg0 : i32, i32
  }
  func.func @transform_3(%arg0: i32) -> (i32, i32, i32) {
    %c0_i32 = arith.constant 0 : i32
    %c0_i32_0 = arith.constant 0 : i32
    %c0_i32_1 = arith.constant 0 : i32
    return %arg0, %c0_i32, %c0_i32_0 : i32, i32, i32
  }
}

</mosaic_0001>

<bundles_post_ra>
// kernel: tpu_custom_call.1
= control target key start
LH: loop header
LB: loop body
LE: loop exit
PB: predicated region body
PF: predicated region fallthrough
CT: control target
= control target key end

     0   :  { %8 = vsyncpa [#allocation3], 0  ;;  %s651_s0 = inlined_call_operand.vmem [shape: s32[2,1], index: 0, kind: input, shape index: {}]   ;;  %s652_s1 = inlined_call_operand.hbm [shape: f32[2,256], index: 1, kind: input, shape index: {}]   ;;  %s653_s2 = inlined_call_operand.vmem [shape: f32[2,256], index: 2, kind: input, shape index: {}]   ;;  %s654_s3 = inlined_call_operand.hbm [shape: f32[2,1,128], index: 3, kind: output, shape index: {}]  }
   0x1   :  { %10 = vsyncpa [#allocation3 + $0x1], 0 }
   0x2   :  { %11 = vsyncpa [#allocation4], 0 }
   0x3   :  { %13 = vsyncpa [#allocation4 + $0x1], 0  ;;  %s514_s12 = smov 0   ;;  %s516_s13 = smov 0  }
   0x4   :  { %s518_s14 = smov 0   ;;  %s520_s15 = smov 0  }
   0x5 LB: > { %s535_s16 = sadd.s32 4294967295, %s491_s15   ;;  %s330_s17 = sadd.s32 4294967294, %s491_s15   ;;  %s491_s15 = sphi %s520_s15, %s664_s15   ;;  %s487_s14 = sphi %s518_s14, %s663_s14   ;;  %s483_s13 = sphi %s516_s13, %s662_s13   ;;  %s479_s12 = sphi %s514_s12, %s661_s12  }
   0x6   : > { %s539_s18 = sadd.s32 1, %s491_s15   ;;  %s47_s19 = sadd.s32 1, %s487_s14 }
   0x7   : > { %s44_s20 = ssub.s32 %s491_s15, %s539_s18  ;;  %p54_p0 = scmp.ne.s32.totalorder %s487_s14, %s483_s13 }
   0x8   : > { %p45_p1 = scmp.eq.s32.totalorder %s44_s20, 0  ;;  %p55_p2 = scmp.eq.s32.totalorder %s491_s15, 0 }
   0x9   : > { %p60_p3 = scmp.ne.s32.totalorder %s483_s13, %s479_s12  ;;  %p61_p4 = scmp.eq.s32.totalorder %s535_s16, 0 }
   0xa   : > { %s551_s21 = scalar_select %p45_p1, %s487_s14, %s47_s19  }
   0xb   : > { %p553_p5 = por %p55_p2, %p54_p0  ;;  %p557_p6 = por %p61_p4, %p60_p3 }
   0xc   : > { %p110_p7 = scmp.eq.s32.totalorder %s535_s16, 1  ;;  %p116_p8 = scmp.eq.s32.totalorder %s330_s17, 1 }
   0xd   : > { %p355_p10 = scmp.lt.s32.totalorder %s491_s15, 2  ;;  %s139_s26 = sand.u32 1, %s487_s14  }
   0xe   : > { %p564_p11 = por %p110_p7, %p54_p0  ;;  %p568_p12 = por %p116_p8, %p60_p3 }
   0xf   : > { %s334_s27 = sshll.u32 %s491_s15, 1  ;;  %s333_s28 = sshll.u32 %s139_s26, 1 }
  0x10   : > { %s147_s4 = scalar_lea.hbm %s652_s1, %s334_s27  ;;  %s143_s6 = scalar_lea.vmem [#allocation2], %s333_s28 }
  0x11   : > { %s149_s5 = sshll.u32 %s147_s4, 4  ;;  %s151_s7 = sshll.u32 %s143_s6, 4  ;;  %s150_s5 = int_to_ptr.hbm [resolvable:$true] %s149_s5  ;;  %s152_s7 = int_to_ptr.vmem [resolvable:$true] %s151_s7 }
  0x12   : > { %p579_p13 = pnand %p355_p10, %p553_p5  ;;  %p335_p0 = scmp.ge.s32.totalorder %s491_s15, 1 }
  0x13   : > { %p163_p1 = scmp.lt.s32.totalorder %s491_s15, 3  ;;  %s140_s9 = scalar_lea.sflag [#allocation3], %s139_s26 }
  0x14   : > { %s395_s10 = sshra.s32 %s150_s5, 4  ;;  %p399_p3 = pneg %p579_p13  ;;  %s396_s10 = int_to_ptr.hbm [resolvable:$true] %s395_s10 }
  0x15   : > { %s397_s11 = scalar_lea.hbm %s396_s10, 2  ;;  %s402_s20 = scalar_lea.hbm %s652_s1, 4 }
  0x16   : > { %p398_p2 = scmp.ne.s32.totalorder %s396_s10, %s397_s11  ;;  %p403_p5 = scmp.lt.s32.totalorder %s396_s10, %s652_s1 }
  0x17   : > { %p404_p8 = scmp.lt.s32.totalorder %s402_s20, %s397_s11 }
  0x18   : > { %p400_p4 = pnand %p399_p3, %p398_p2 }
  0x19   : > { %p405_p10 = por %p404_p8, %p403_p5 }
  0x1a   : > { %p401_p7 = pneg %p400_p4 }
  0x1c   : > { %p406_p9 = pnand %p405_p10, %p401_p7 }
  0x1e   : > { %409 = shalt.err (!%p406_p9)
}
  0x1f   : > { %350 = dma.hbm_to_vmem [thread:$0]  (!%p579_p13), %s150_s5, 32, %s152_s7, %s140_s9  }
  0x20   : > { %p164_p2 = pnand %p335_p0, %p163_p1 }
  0x21   : > { %s600_s26 = sand.u32 (!%p164_p2), 1, %s483_s13  }
  0x22   : > { %167 = sbr.rel (%p164_p2) target bundleno = 343 (0x157), region = 32  ;;  %s336_s28 = sshll.u32 (!%p164_p2), %s600_s26, 1 }
  0x23   : > { %s170_s29 = scalar_lea.sflag (!%p164_p2), [#allocation3], %s600_s26  ;;  %s173_s30 = scalar_lea.vmem (!%p164_p2), [#allocation2], %s336_s28 }
  0x27   : > { %470 = dma.done.wait (%p557_p6), %s170_s29, 32  }
  0x28   : > { %472 = vsyncadd (%p557_p6), %s170_s29, 4294967264  ;;  %v493_v0 = vmov 0   ;;  %v219_v1 = vld [vmem:[%s651_s0] sm:$0x3]  ;;  %p200_p9 = scmp.lt.s32.totalorder %s535_s16, 1  ;;  %v215_v9 = vlaneseq  ;;  %s338_s23 = sshll.u32 %s535_s16, 7 }
  0x29   : > { %390 = vset.pattern.permute.xlu0 %v493_v0  ;;  %v220_v2 = vmul.u32 32, %v219_v1  ;;  %v204_v3 = vld [vmem:[%s173_s30] sm:$0x3]  ;;  %v217_v13 = vstv %s338_s23  ;;  %vm226_vm0 = vcmask 1041408   ;;  %s248_s19 = scalar_lea.hbm %s654_s3, %s535_s16  ;;  %s199_s20 = scalar_lea.vmem [#allocation5], %s600_s26 }
  0x2a   : > { %s201_s6 = scalar_select %p200_p9, %s535_s16, 1  ;;  %v206_v5 = vmax.f32 %v204_v3, 0.001  ;;  %v216_v12 = vand.u32 127, %v215_v9 }
  0x2b   : > { %222 = vperm.xlu0 %390, %v220_v2   ;;  %s250_s22 = sshll.u32 %s199_s20, 4  ;;  %s252_s27 = sshll.u32 %s248_s19, 4  ;;  %s251_s22 = int_to_ptr.vmem [resolvable:$true] %s250_s22  ;;  %s253_s27 = int_to_ptr.hbm [resolvable:$true] %s252_s27 }
  0x2c   : > { %s337_s7 = sshll.u32 %s201_s6, 1  ;;  %391 = vlog2.f32 %v206_v5  ;;  %v218_v15 = vadd.s32 %v217_v13, %v216_v12  ;;  %s240_s29 = scalar_lea.sflag [#allocation4], %s600_s26 }
  0x2d   : > { %s203_s10 = scalar_lea.vmem %s653_s2, %s337_s7  ;;  %s439_s30 = sshra.s32 %s253_s27, 4  ;;  %s440_s30 = int_to_ptr.hbm [resolvable:$true] %s439_s30 }
  0x2e   : > { %v205_v4 = vld [vmem:[%s203_s10] sm:$0x3]  ;;  %s441_s4 = scalar_lea.hbm %s440_s30, 1  ;;  %s445_s16 = scalar_lea.hbm %s654_s3, 2 }
  0x2f   : > { %v209_v6 = vmax.f32 %v205_v4, 0.001  ;;  %p442_p6 = scmp.ne.s32.totalorder %s440_s30, %s441_s4  ;;  %p446_p1 = scmp.lt.s32.totalorder %s440_s30, %s654_s3 }
  0x30   : > { %p447_p3 = scmp.lt.s32.totalorder %s445_s16, %s441_s4 }
  0x31   : > { %393 = vlog2.f32 %v209_v6  ;;  %p443_p13 = pnand %p442_p6, %p564_p11 }
  0x32   : > { %v392_v7 = vpop.eup %391  ;;  %p448_p4 = por %p447_p3, %p446_p1 }
  0x33   : > { %v208_v10 = vmul.f32 0.6931472, %v392_v7  ;;  %p444_p0 = pneg %p443_p13 }
  0x35   : > { %p449_p7 = pnand %p448_p4, %p444_p0 }
  0x37   : > { %v394_v8 = vpop.eup %393 }
  0x38   : > { %v211_v11 = vmul.f32 0.6931472, %v394_v8 }
  0x3a   : > { %v212_v14 = vsub.f32 %v208_v10, %v211_v11 }
  0x3c   : > { %v213_v16 = vmul.f32 %v212_v14, %v212_v14 }
  0x9d   : > { %v223_v17 = vpop.permute.xlu0 %222 }
  0x9e   : > { %vm224_vm1 = vcmp.lt.s32.totalorder %v218_v15, %v223_v17 }
  0x9f   : > { %v225_v18 = vsel %vm224_vm1, %v213_v16, 0.0 }
  0xa0   : > { %v227_v19 = vsel %vm226_vm0, %v225_v18, 0.0 }
  0xa1   : > { %228 = vadd.xlane.f32.xlu0 %v227_v19 }
 0x114   : > { %v229_v20 = vpop.xlane.xlu0 %228 }
 0x115   : > { %v230_v21 = vrot.slane %v229_v20, 4 }
 0x117   : > { %v231_v22 = vadd.f32 %v230_v21, %v229_v20 }
 0x119   : > { %v232_v23 = vrot.slane %v231_v22, 2 }
 0x11b   : > { %v233_v24 = vadd.f32 %v232_v23, %v231_v22 }
 0x11d   : > { %v234_v25 = vrot.slane %v233_v24, 1 }
 0x11f   : > { %v235_v26 = vadd.f32 %v234_v25, %v233_v24 }
 0x121   : > { %341 = vpush %v235_v26 }
 0x152   : > { %s342_s28 = spop %341 }
 0x153   : > { %v237_v27 = vstv %s342_s28 }
 0x154   : > { %238 = vst [vmem:[%s199_s20] sm:$0x1] %v237_v27 }
 0x155   : > { %452 = shalt.err (!%p449_p7)
}
 0x156   : > { %345 = dma.vmem_to_hbm [thread:$0]  (%p564_p11), %s251_s22, 16, %s253_s27, %s240_s29  }
 0x157 PF: > { %s264_s26 = sand.u32 1, %s479_s12   ;;  %p660_p5 = scmp.ge.s32.totalorder %s491_s15, 2 }
 0x158   : > { %s265_s9 = scalar_lea.sflag [#allocation4], %s264_s26 }
 0x159   : > { %p352_p8 = pnand %p660_p5, %p568_p12 }
 0x15b   : > { %p353_p10 = pneg %p352_p8 }
 0x15d   : > { %474 = dma.done.wait (%p353_p10), %s265_s9, 16  }
 0x15e   : > { %476 = vsyncadd (%p353_p10), %s265_s9, 4294967280  ;;  %p16_p2 = scmp.ge.s32.totalorder %s539_s18, 4   ;;  %s661_s12 = smov %s483_s13 }
 0x15f   : > { %s662_s13 = smov %s487_s14  ;;  %s663_s14 = smov %s551_s21 }
 0x160   : > { %s664_s15 = smov %s539_s18  ;;  %18 = sbr.rel (!%p16_p2) target bundleno = 5 (0x5), region = 80 }
 0x165   :  { %270 = vsyncpa [#allocation3], 1 }
 0x166   :  { %272 = vsyncpa [#allocation3 + $0x1], 1 }
 0x167   :  { %273 = vsyncpa [#allocation4], 1 }
 0x168   :  { %275 = vsyncpa [#allocation4 + $0x1], 1 }

</bundles_post_ra>
